<compile_context>
chip_gen: v7x
topology: tpu7x:2x2x1
jax: 0.10.0
libtpu: 0.0.40
codegen_flags: <defaults>
</compile_context>

<pallas_src>
import functools

import jax
import jax.numpy as jnp
from jax import lax
from jax.experimental import pallas as pl
from jax.experimental.pallas import tpu as pltpu


_VMEM_BUDGET = 24 << 20   # tile-sizing budget (safe on v7x 32 MiB scoped default)
_VMEM_LIMIT = 32 << 20    # requested scoped VMEM (valid on v5e/v6e/v7x)
_TK_MAX = 2048            # keep d_in resident (single K block) up to this size


def _round_up(n, m):
    return ((n + m - 1) // m) * m


# ---------------------------------------------------------------------------
# Kernels
# ---------------------------------------------------------------------------
def _affine_kernel(x_ref, w_ref, b_ref, o_ref):
    # x_ref: (TM, d_in); w_ref: (TN, d_in) (torch layout, contracted on axis 1);
    # b_ref: (1, TN) f32; o_ref: (TM, TN) lane-dense.
    acc = lax.dot_general(
        x_ref[...], w_ref[...],
        dimension_numbers=(((1,), (1,)), ((), ())),
        preferred_element_type=jnp.float32)
    o_ref[...] = (acc + b_ref[...]).astype(o_ref.dtype)


def _affine_kernel_ktiled(x_ref, w_ref, b_ref, o_ref, acc_ref, *, tk, d_in):
    # Reduction over d_in on the innermost ("arbitrary") grid axis.
    k = pl.program_id(2)

    @pl.when(k == 0)
    def _():
        acc_ref[...] = jnp.zeros_like(acc_ref)

    x = x_ref[...]
    w = w_ref[...]
    if d_in % tk != 0:  # static: mask garbage columns of the overhanging K block
        col = lax.broadcasted_iota(jnp.int32, (1, tk), 1) + k * tk
        valid = col < d_in
        x = jnp.where(valid, x, jnp.zeros_like(x))
        w = jnp.where(valid, w, jnp.zeros_like(w))

    acc_ref[...] += lax.dot_general(
        x, w, dimension_numbers=(((1,), (1,)), ((), ())),
        preferred_element_type=jnp.float32)

    @pl.when(k == pl.num_programs(2) - 1)
    def _():
        o_ref[...] = (acc_ref[...] + b_ref[...]).astype(o_ref.dtype)


def _affine_scalar_kernel(x_ref, w_ref, b_ref, o_ref):
    # d_in == d_out == 1: y = w * x + b; w/b are (1,) f32 scalars in SMEM.
    xv = x_ref[...].astype(jnp.float32)
    o_ref[...] = (xv * w_ref[0] + b_ref[0]).astype(o_ref.dtype)


# ---------------------------------------------------------------------------
# Tile selection
# ---------------------------------------------------------------------------
def _pick_tiles(N, d_in, d_out_pad):
    # K (reduction) tile: keep d_in resident when small, stream it when large.
    tk = d_in if d_in <= _TK_MAX else 512

    # N (output-column) tile: lane-dense multiple of 128 dividing d_out_pad.
    if d_out_pad <= 512:
        tn = d_out_pad
    elif d_out_pad % 512 == 0:
        tn = 512
    elif d_out_pad % 256 == 0:
        tn = 256
    else:
        tn = 128

    # M (row) tile: as large as the VMEM budget allows (grid steps are a serial
    # loop with ~0.35us overhead each, so big tiles amortize it).
    def vmem_bytes(tm):
        # double-buffered x/out/w/b blocks + f32 accumulator scratch
        return 4 * (2 * tm * tk + 2 * tm * tn + 2 * tn * tk + 2 * tn + tm * tn)

    tm = min(2048, _round_up(max(N, 8), 128))
    while tm > 128 and vmem_bytes(tm) > _VMEM_BUDGET:
        tm //= 2
    return max(tm, 128), tn, tk


# ---------------------------------------------------------------------------
# Wrappers
# ---------------------------------------------------------------------------
def _affine_matmul(x2d, weight, bias):
    """x2d: (N, d_in); weight: (d_out, d_in); bias: (d_out,) or None."""
    N, d_in = x2d.shape
    d_out = weight.shape[0]

    compute_dtype = jnp.result_type(x2d.dtype, weight.dtype)
    x2d = x2d.astype(compute_dtype)
    w = jnp.asarray(weight, compute_dtype)

    # Lane-dense output: pad the (small) weight/bias along d_out, never x.
    d_out_pad = _round_up(d_out, 128)
    if d_out_pad != d_out:
        w = jnp.pad(w, ((0, d_out_pad - d_out), (0, 0)))
    b = (jnp.asarray(bias, jnp.float32) if bias is not None
         else jnp.zeros((d_out,), jnp.float32)).reshape(1, d_out)
    if d_out_pad != d_out:
        b = jnp.pad(b, ((0, 0), (0, d_out_pad - d_out)))

    tm, tn, tk = _pick_tiles(N, d_in, d_out_pad)
    grid_m = pl.cdiv(N, tm)
    grid_n = d_out_pad // tn
    grid_k = pl.cdiv(d_in, tk)

    itemsize = jnp.dtype(compute_dtype).itemsize
    cost = pl.CostEstimate(
        flops=2 * N * d_in * d_out_pad,
        transcendentals=0,
        bytes_accessed=itemsize * (N * d_in + d_out_pad * d_in + N * d_out_pad)
        + 4 * d_out_pad,
    )

    if grid_k == 1:
        out = pl.pallas_call(
            _affine_kernel,
            out_shape=jax.ShapeDtypeStruct((N, d_out_pad), compute_dtype),
            grid_spec=pltpu.PrefetchScalarGridSpec(
                num_scalar_prefetch=0,
                grid=(grid_m, grid_n),
                in_specs=[
                    pl.BlockSpec((tm, d_in), lambda i, j: (i, 0)),
                    pl.BlockSpec((tn, d_in), lambda i, j: (j, 0)),
                    pl.BlockSpec((1, tn), lambda i, j: (0, j)),
                ],
                out_specs=pl.BlockSpec((tm, tn), lambda i, j: (i, j)),
            ),
            compiler_params=pltpu.CompilerParams(
                dimension_semantics=("parallel", "parallel"),
                vmem_limit_bytes=_VMEM_LIMIT),
            cost_estimate=cost,
        )(x2d, w, b)
    else:
        kern = functools.partial(_affine_kernel_ktiled, tk=tk, d_in=d_in)
        out = pl.pallas_call(
            kern,
            out_shape=jax.ShapeDtypeStruct((N, d_out_pad), compute_dtype),
            grid_spec=pltpu.PrefetchScalarGridSpec(
                num_scalar_prefetch=0,
                grid=(grid_m, grid_n, grid_k),
                in_specs=[
                    pl.BlockSpec((tm, tk), lambda i, j, k: (i, k)),
                    pl.BlockSpec((tn, tk), lambda i, j, k: (j, k)),
                    pl.BlockSpec((1, tn), lambda i, j, k: (0, j)),
                ],
                out_specs=pl.BlockSpec((tm, tn), lambda i, j, k: (i, j)),
                scratch_shapes=[pltpu.VMEM((tm, tn), jnp.float32)],
            ),
            compiler_params=pltpu.CompilerParams(
                dimension_semantics=("parallel", "parallel", "arbitrary"),
                vmem_limit_bytes=_VMEM_LIMIT),
            cost_estimate=cost,
        )(x2d, w, b)

    if d_out_pad != d_out:
        out = out[:, :d_out]
    return out


def _affine_scalar(x, weight, bias):
    """d_in == d_out == 1 branch: y = w.flatten() * x + b.flatten()."""
    out_dtype = jnp.result_type(x.dtype, weight.dtype)
    orig_shape = x.shape
    flat = x.reshape(-1)
    n = flat.shape[0]

    w = jnp.asarray(weight, jnp.float32).reshape(-1)[:1]
    b = (jnp.asarray(bias, jnp.float32).reshape(-1)[:1] if bias is not None
         else jnp.zeros((1,), jnp.float32))

    blk_target = 512 * 1024                       # 2 MiB f32 per buffer
    blk = n if n <= blk_target else blk_target    # full extent or 128-multiple
    grid = (pl.cdiv(n, blk),)

    out = pl.pallas_call(
        _affine_scalar_kernel,
        out_shape=jax.ShapeDtypeStruct((n,), out_dtype),
        grid_spec=pltpu.PrefetchScalarGridSpec(
            num_scalar_prefetch=0,
            grid=grid,
            in_specs=[
                pl.BlockSpec((blk,), lambda i: (i,)),
                pl.BlockSpec(memory_space=pltpu.MemorySpace.SMEM),
                pl.BlockSpec(memory_space=pltpu.MemorySpace.SMEM),
            ],
            out_specs=pl.BlockSpec((blk,), lambda i: (i,)),
        ),
        compiler_params=pltpu.CompilerParams(
            dimension_semantics=("parallel",),
            vmem_limit_bytes=_VMEM_LIMIT),
        cost_estimate=pl.CostEstimate(
            flops=2 * n, transcendentals=0,
            bytes_accessed=flat.dtype.itemsize * n
            + jnp.dtype(out_dtype).itemsize * n + 8),
    )(flat, w, b)
    return out.reshape(orig_shape)


def affine_forward(x, weight, bias, d_in, d_out, dim=-1):
    """Pallas equivalent of Affine.forward (keeps the module's semantics)."""
    x = jnp.asarray(x)
    weight = jnp.asarray(weight)
    if d_in == 1 and d_out == 1:
        return _affine_scalar(x, weight, bias)
    if dim != -1:
        x = jnp.swapaxes(x, dim, -1)
    ns = x.shape
    if d_in != ns[-1]:
        raise TypeError(f"Invalid shape {ns} for d_in={d_in}")
    y2d = _affine_matmul(x.reshape(-1, ns[-1]), weight, bias)
    y = y2d.reshape(*ns[:-1], d_out)
    return y if dim == -1 else jnp.swapaxes(y, -1, dim)


# ---------------------------------------------------------------------------
# Deterministic parameter init (nn.Linear-style shapes, synthetic values)
# ---------------------------------------------------------------------------
def init_affine_params(key, d_in, d_out, bias=True):
    kw, kb = jax.random.split(key)
    bound = 1.0 / jnp.sqrt(jnp.maximum(d_in, 1)).astype(jnp.float32)
    weight = jax.random.uniform(kw, (d_out, d_in), jnp.float32, -bound, bound)
    b = (jax.random.uniform(kb, (d_out,), jnp.float32, -bound, bound)
         if bias else None)
    return weight, b


if __name__ == "__main__":
    key = jax.random.PRNGKey(0)
    k0, k1, k2, k3, k4, k5 = jax.random.split(key, 6)

    # Case 1: standard linear along last dim.  d_in=32, d_out=48, x=(2, 8, 32)
    d_in, d_out = 32, 48
    w, b = init_affine_params(k0, d_in, d_out, bias=True)
    x = jax.random.normal(k1, (2, 8, d_in), jnp.float32)
    y = affine_forward(x, w, b, d_in, d_out, dim=-1)
    y_ref = jnp.einsum("bsi,oi->bso", x, w) + b
    assert y.shape == (2, 8, d_out)
    assert jnp.allclose(y, y_ref, atol=1e-4, rtol=1e-4)

    # Case 2: affine along dim=1 (channel axis).  x=(2, 32, 16) -> (2, 48, 16)
    x2 = jax.random.normal(k2, (2, d_in, 16), jnp.float32)
    y2 = affine_forward(x2, w, b, d_in, d_out, dim=1)
    y2_ref = jnp.einsum("bis,oi->bos", x2, w) + b[None, :, None]
    assert y2.shape == (2, d_out, 16)
    assert jnp.allclose(y2, y2_ref, atol=1e-4, rtol=1e-4)

    # Case 3: d_in == d_out == 1 scalar scale+shift path.  x=(2, 4, 16, 16)
    w1, b1 = init_affine_params(k3, 1, 1, bias=True)
    x3 = jax.random.normal(k3, (2, 4, 16, 16), jnp.float32)
    y3 = affine_forward(x3, w1, b1, 1, 1, dim=-1)
    y3_ref = w1.reshape(()) * x3 + b1.reshape(())
    assert y3.shape == x3.shape
    assert jnp.allclose(y3, y3_ref, atol=1e-5, rtol=1e-5)

    # Case 4: many rows -> multi-block row grid with an overhanging last block.
    x4 = jax.random.normal(k4, (2, 1100, d_in), jnp.float32)
    y4 = affine_forward(x4, w, b, d_in, d_out, dim=-1)
    y4_ref = jnp.einsum("bsi,oi->bso", x4, w) + b
    assert y4.shape == (2, 1100, d_out)
    assert jnp.allclose(y4, y4_ref, atol=1e-4, rtol=1e-4)

    # Case 5: large d_in / d_out -> K-tiled reduction (with tail mask) + N tiling.
    d_in5, d_out5 = 2176, 640
    w5, b5 = init_affine_params(k5, d_in5, d_out5, bias=True)
    x5 = jax.random.normal(k5, (4, 64, d_in5), jnp.float32)
    y5 = affine_forward(x5, w5, b5, d_in5, d_out5, dim=-1)
    y5_ref = jnp.einsum("bsi,oi->bso", x5, w5) + b5
    assert y5.shape == (4, 64, d_out5)
    assert jnp.allclose(y5, y5_ref, atol=2e-3, rtol=1e-3)

    jax.block_until_ready((y, y2, y3, y4, y5))
    print("KERNEL_OK")
</pallas_src>

<mosaic_0001>
module attributes {stable_mosaic.version = 11 : i64} {
  func.func @_affine_kernel(%arg0: i32, %arg1: i32, %arg2: memref<128x32xf32, #tpu.memory_space<vmem>>, %arg3: memref<128x32xf32, #tpu.memory_space<vmem>>, %arg4: memref<1x128xf32, #tpu.memory_space<vmem>>, %arg5: memref<128x128xf32, #tpu.memory_space<vmem>>) attributes {dimension_semantics = [#tpu.dimension_semantics<parallel>, #tpu.dimension_semantics<parallel>], iteration_bounds = array<i64: 1, 1>, scalar_prefetch = 0 : i64, scratch_operands = 0 : i64, tpu.core_type = #tpu.core_type<tc>, window_params = [{transform_indices = @transform_0, window_bounds = array<i64: 128, 32>}, {transform_indices = @transform_1, window_bounds = array<i64: 128, 32>}, {transform_indices = @transform_2, window_bounds = array<i64: 1, 128>}, {transform_indices = @transform_3, window_bounds = array<i64: 128, 128>}]} {
    %c0 = arith.constant 0 : index
    %c0_0 = arith.constant 0 : index
    %0 = vector.load %arg2[%c0, %c0_0] : memref<128x32xf32, #tpu.memory_space<vmem>>, vector<128x32xf32>
    %c0_1 = arith.constant 0 : index
    %c0_2 = arith.constant 0 : index
    %1 = vector.load %arg3[%c0_1, %c0_2] : memref<128x32xf32, #tpu.memory_space<vmem>>, vector<128x32xf32>
    %cst = arith.constant dense<0.000000e+00> : vector<128x128xf32>
    %2 = tpu.matmul %0, %1, %cst {dimension_numbers = #tpu.dot_dimension_numbers<[1], [1], [0], [0], [0, 0, 1, 0], [], []>} : vector<128x32xf32>, vector<128x32xf32>, vector<128x128xf32> -> vector<128x128xf32>
    %c0_3 = arith.constant 0 : index
    %c0_4 = arith.constant 0 : index
    %3 = vector.load %arg4[%c0_3, %c0_4] : memref<1x128xf32, #tpu.memory_space<vmem>>, vector<1x128xf32>
    %4 = vector.broadcast %3 : vector<1x128xf32> to vector<128x128xf32>
    %5 = arith.addf %2, %4 : vector<128x128xf32>
    %c0_5 = arith.constant 0 : index
    %c0_6 = arith.constant 0 : index
    %6 = vector.load %arg5[%c0_5, %c0_6] : memref<128x128xf32, #tpu.memory_space<vmem>>, vector<128x128xf32>
    tpu.vector_store %arg5[%c0_5, %c0_6], %5 {strides = array<i32>} : memref<128x128xf32, #tpu.memory_space<vmem>>, vector<128x128xf32>,
    return
  }
  func.func @transform_0(%arg0: i32, %arg1: i32) -> (i32, i32) {
    %c0_i32 = arith.constant 0 : i32
    %c0_i32_0 = arith.constant 0 : i32
    return %arg0, %c0_i32 : i32, i32
  }
  func.func @transform_1(%arg0: i32, %arg1: i32) -> (i32, i32) {
    %c0_i32 = arith.constant 0 : i32
    %c0_i32_0 = arith.constant 0 : i32
    return %arg1, %c0_i32 : i32, i32
  }
  func.func @transform_2(%arg0: i32, %arg1: i32) -> (i32, i32) {
    %c0_i32 = arith.constant 0 : i32
    %c0_i32_0 = arith.constant 0 : i32
    return %c0_i32, %arg1 : i32, i32
  }
  func.func @transform_3(%arg0: i32, %arg1: i32) -> (i32, i32) {
    %c0_i32 = arith.constant 0 : i32
    return %arg0, %arg1 : i32, i32
  }
}

</mosaic_0001>

<bundles_post_ra>
// kernel: tpu_custom_call.1
= control target key start
LH: loop header
LB: loop body
LE: loop exit
PB: predicated region body
PF: predicated region fallthrough
CT: control target
= control target key end

     0   :  { %8 = vsyncpa [#allocation3], 0  ;;  %vm54_vm0 = vcmask 261120   ;;  %s760_s0 = inlined_call_operand.vmem [shape: f32[16,32], index: 0, kind: input, shape index: {}]   ;;  %s761_s1 = inlined_call_operand.vmem [shape: f32[128,32], index: 1, kind: input, shape index: {}]   ;;  %s762_s2 = inlined_call_operand.vmem [shape: f32[1,128], index: 2, kind: input, shape index: {}]   ;;  %s763_s3 = inlined_call_operand.hbm [shape: f32[16,128], index: 3, kind: output, shape index: {}]  }
   0x1   :  { %v31_v0 = vld [vmem:[%s761_s1] sm:$0xff]  ;;  %v32_v1 = vld [vmem:[%s761_s1 + $0x8] sm:$0xff]  ;;  %vm571_vm1 = vmpackc.low %vm54_vm0, %vm54_vm0 }
   0x2   :  { %v449_v2 = vpack.c.bf16 %v32_v1, %v31_v0  ;;  %v33_v4 = vld [vmem:[%s761_s1 + $0x10] sm:$0xff]  ;;  %v34_v5 = vld [vmem:[%s761_s1 + $0x18] sm:$0xff]  ;;  %v35_v7 = vld [vmem:[%s761_s1 + $0x20] sm:$0xff] }
   0x3   :  { %v455_v6 = vpack.c.bf16 %v34_v5, %v33_v4  ;;  %v36_v8 = vld [vmem:[%s761_s1 + $0x28] sm:$0xff]  ;;  %v15_v9 = vld [vmem:[%s760_s0] sm:$0xff]  ;;  %v37_v12 = vld [vmem:[%s761_s1 + $0x30] sm:$0xff] }
   0x4   :  { %451 = vmatprep.subr.msk.bf16.mxu0 %vm571_vm1, %v449_v2  ;;  %497 = vmatprep.subr.msk.bf16.mxu1 %vm571_vm1, %v449_v2  ;;  %v23_v10 = vld [vmem:[%s760_s0 + $0x40] sm:$0xff]  ;;  %v461_v11 = vpack.c.bf16 %v36_v8, %v35_v7  ;;  %v38_v13 = vld [vmem:[%s761_s1 + $0x38] sm:$0xff]  ;;  %v40_v16 = vld [vmem:[%s761_s1 + $0x48] sm:$0xff] }
   0x5   :  { %454 = vmatpush3.bf16.xpose.msk.msra.mxu0 %vm571_vm1, %v449_v2  ;;  %505 = vmatpush3.bf16.xpose.msk.msra.mxu1 %vm571_vm1, %v449_v2  ;;  %v467_v14 = vpack.c.bf16 %v38_v13, %v37_v12  ;;  %v39_v15 = vld [vmem:[%s761_s1 + $0x40] sm:$0xff]  ;;  %v41_v18 = vld [vmem:[%s761_s1 + $0x50] sm:$0xff]  ;;  %v42_v19 = vld [vmem:[%s761_s1 + $0x58] sm:$0xff] }
   0x6   :  { %457 = vmatprep.subr.msk.bf16.mxu0 %vm571_vm1, %v455_v6  ;;  %498 = vmatprep.subr.msk.bf16.mxu1 %vm571_vm1, %v455_v6  ;;  %v473_v17 = vpack.c.bf16 %v40_v16, %v39_v15  ;;  %v479_v20 = vpack.c.bf16 %v42_v19, %v41_v18  ;;  %v43_v21 = vld [vmem:[%s761_s1 + $0x60] sm:$0xff]  ;;  %v44_v22 = vld [vmem:[%s761_s1 + $0x68] sm:$0xff]  ;;  %v45_v24 = vld [vmem:[%s761_s1 + $0x70] sm:$0xff] }
   0x7   :  { %425 = vmatprep.mubr.msk.f32.mxu0 %vm54_vm0, %v15_v9  ;;  %437 = vmatprep.mubr.msk.f32.mxu1 %vm54_vm0, %v23_v10  ;;  %v485_v23 = vpack.c.bf16 %v44_v22, %v43_v21  ;;  %v46_v25 = vld [vmem:[%s761_s1 + $0x78] sm:$0xff]  ;;  %v16_v27 = vld [vmem:[%s760_s0 + $0x8] sm:$0xff]  ;;  %v17_v29 = vld [vmem:[%s760_s0 + $0x10] sm:$0xff] }
   0x8   :  { %v491_v26 = vpack.c.bf16 %v46_v25, %v45_v24  ;;  %v24_v28 = vld [vmem:[%s760_s0 + $0x48] sm:$0xff]  ;;  %v25_v30 = vld [vmem:[%s760_s0 + $0x50] sm:$0xff]  ;;  %v18_v31 = vld [vmem:[%s760_s0 + $0x18] sm:$0xff] }
   0x9   :  { %v26_v32 = vld [vmem:[%s760_s0 + $0x58] sm:$0xff]  ;;  %v19_v33 = vld [vmem:[%s760_s0 + $0x20] sm:$0xff]  ;;  %v20_v35 = vld [vmem:[%s760_s0 + $0x28] sm:$0xff] }
   0xa   :  { %v27_v34 = vld [vmem:[%s760_s0 + $0x60] sm:$0xff]  ;;  %v28_v36 = vld [vmem:[%s760_s0 + $0x68] sm:$0xff]  ;;  %v21_v37 = vld [vmem:[%s760_s0 + $0x30] sm:$0xff] }
   0xb   :  { %v29_v38 = vld [vmem:[%s760_s0 + $0x70] sm:$0xff]  ;;  %v22_v39 = vld [vmem:[%s760_s0 + $0x38] sm:$0xff]  ;;  %v328_v41 = vld [vmem:[%s762_s2] ss:$0 sm:$0xff] }
   0xc   :  { %v30_v40 = vld [vmem:[%s760_s0 + $0x78] sm:$0xff] }
   0xd   :  { %460 = vmatpush3.bf16.xpose.msk.msra.mxu0 %vm571_vm1, %v455_v6  ;;  %506 = vmatpush3.bf16.xpose.msk.msra.mxu1 %vm571_vm1, %v455_v6 }
   0xe   :  { %463 = vmatprep.subr.msk.bf16.mxu0 %vm571_vm1, %v461_v11  ;;  %499 = vmatprep.subr.msk.bf16.mxu1 %vm571_vm1, %v461_v11 }
  0x15   :  { %466 = vmatpush3.bf16.xpose.msk.msra.mxu0 %vm571_vm1, %v461_v11  ;;  %507 = vmatpush3.bf16.xpose.msk.msra.mxu1 %vm571_vm1, %v461_v11 }
  0x16   :  { %469 = vmatprep.subr.msk.bf16.mxu0 %vm571_vm1, %v467_v14  ;;  %500 = vmatprep.subr.msk.bf16.mxu1 %vm571_vm1, %v467_v14 }
  0x1d   :  { %472 = vmatpush3.bf16.xpose.msk.msra.mxu0 %vm571_vm1, %v467_v14  ;;  %508 = vmatpush3.bf16.xpose.msk.msra.mxu1 %vm571_vm1, %v467_v14 }
  0x1e   :  { %475 = vmatprep.subr.msk.bf16.mxu0 %vm571_vm1, %v473_v17  ;;  %501 = vmatprep.subr.msk.bf16.mxu1 %vm571_vm1, %v473_v17 }
  0x25   :  { %478 = vmatpush3.bf16.xpose.msk.msra.mxu0 %vm571_vm1, %v473_v17  ;;  %509 = vmatpush3.bf16.xpose.msk.msra.mxu1 %vm571_vm1, %v473_v17 }
  0x26   :  { %481 = vmatprep.subr.msk.bf16.mxu0 %vm571_vm1, %v479_v20  ;;  %502 = vmatprep.subr.msk.bf16.mxu1 %vm571_vm1, %v479_v20 }
  0x2d   :  { %484 = vmatpush3.bf16.xpose.msk.msra.mxu0 %vm571_vm1, %v479_v20  ;;  %510 = vmatpush3.bf16.xpose.msk.msra.mxu1 %vm571_vm1, %v479_v20 }
  0x2e   :  { %487 = vmatprep.subr.msk.bf16.mxu0 %vm571_vm1, %v485_v23  ;;  %503 = vmatprep.subr.msk.bf16.mxu1 %vm571_vm1, %v485_v23 }
  0x35   :  { %490 = vmatpush3.bf16.xpose.msk.msra.mxu0 %vm571_vm1, %v485_v23  ;;  %511 = vmatpush3.bf16.xpose.msk.msra.mxu1 %vm571_vm1, %v485_v23 }
  0x36   :  { %493 = vmatprep.subr.msk.bf16.mxu0 %vm571_vm1, %v491_v26  ;;  %504 = vmatprep.subr.msk.bf16.mxu1 %vm571_vm1, %v491_v26 }
  0x3d   :  { %496 = vmatpush3.bf16.xpose.msk.msra.mxu0 %vm571_vm1, %v491_v26  ;;  %512 = vmatpush3.bf16.xpose.msk.msra.mxu1 %vm571_vm1, %v491_v26 }
  0x44   :  { %426 = vmatmul.mubr.msk.f32.vlgmr.msra.gmra.mrb[0].mxu0 %vm54_vm0, %v16_v27  ;;  %438 = vmatmul.mubr.msk.f32.vlgmr.msra.gmra.mrb[0].mxu1 %vm54_vm0, %v24_v28 }
  0x45   :  { %428 = vmatprep.mubr.msk.f32.mxu0 %vm54_vm0, %v17_v29  ;;  %440 = vmatprep.mubr.msk.f32.mxu1 %vm54_vm0, %v25_v30 }
  0x48   :  { %429 = vmatmul.mubr.msk.f32.gmra.mrb[2].mxu0 %vm54_vm0, %v18_v31  ;;  %441 = vmatmul.mubr.msk.f32.gmra.mrb[2].mxu1 %vm54_vm0, %v26_v32 }
  0x49   :  { %431 = vmatprep.mubr.msk.f32.mxu0 %vm54_vm0, %v19_v33  ;;  %443 = vmatprep.mubr.msk.f32.mxu1 %vm54_vm0, %v27_v34 }
  0x4c   :  { %432 = vmatmul.mubr.msk.f32.gmra.mrb[4].mxu0 %vm54_vm0, %v20_v35  ;;  %444 = vmatmul.mubr.msk.f32.gmra.mrb[4].mxu1 %vm54_vm0, %v28_v36 }
  0x4d   :  { %434 = vmatprep.mubr.msk.f32.mxu0 %vm54_vm0, %v21_v37  ;;  %446 = vmatprep.mubr.msk.f32.mxu1 %vm54_vm0, %v29_v38 }
  0x50   :  { %435 = vmatmul.mubr.msk.f32.gmra.mrb[6].mxu0 %vm54_vm0, %v22_v39  ;;  %447 = vmatmul.mubr.msk.f32.gmra.mrb[6].mxu1 %vm54_vm0, %v30_v40 }
 0x117   :  { %v427_v42 = vpop.f32.mrb[0].mxu0  ;;  %v439_v43 = vpop.f32.mrb[0].mxu1 }
 0x118   :  { %v223_v44 = vadd.f32 %v427_v42, %v328_v41  ;;  %v263_v45 = vadd.f32 %v439_v43, %v328_v41  ;;  %v217_v46 = vpop.f32.mrb[1].mxu0  ;;  %v257_v47 = vpop.f32.mrb[1].mxu1 }
 0x119   :  { %v218_v48 = vadd.f32 %v328_v41, %v217_v46  ;;  %v258_v49 = vadd.f32 %v328_v41, %v257_v47 }
 0x11a   :  { %297 = vst [vmem:[#allocation2 + $0x8] sm:$0xff] %v223_v44  ;;  %305 = vst [vmem:[#allocation2 + $0x48] sm:$0xff] %v263_v45 }
 0x11b   :  { %296 = vst [vmem:[#allocation2] sm:$0xff] %v218_v48  ;;  %304 = vst [vmem:[#allocation2 + $0x40] sm:$0xff] %v258_v49  ;;  %v430_v50 = vpop.f32.mrb[2].mxu0  ;;  %v442_v51 = vpop.f32.mrb[2].mxu1 }
 0x11c   :  { %v233_v52 = vadd.f32 %v430_v50, %v328_v41  ;;  %v273_v53 = vadd.f32 %v442_v51, %v328_v41  ;;  %v227_v54 = vpop.f32.mrb[3].mxu0  ;;  %v267_v55 = vpop.f32.mrb[3].mxu1 }
 0x11d   :  { %v228_v56 = vadd.f32 %v328_v41, %v227_v54  ;;  %v268_v57 = vadd.f32 %v328_v41, %v267_v55 }
 0x11e   :  { %299 = vst [vmem:[#allocation2 + $0x18] sm:$0xff] %v233_v52  ;;  %307 = vst [vmem:[#allocation2 + $0x58] sm:$0xff] %v273_v53 }
 0x11f   :  { %298 = vst [vmem:[#allocation2 + $0x10] sm:$0xff] %v228_v56  ;;  %306 = vst [vmem:[#allocation2 + $0x50] sm:$0xff] %v268_v57  ;;  %v433_v58 = vpop.f32.mrb[4].mxu0  ;;  %v445_v59 = vpop.f32.mrb[4].mxu1 }
 0x120   :  { %v243_v60 = vadd.f32 %v433_v58, %v328_v41  ;;  %v283_v61 = vadd.f32 %v445_v59, %v328_v41  ;;  %v237_v62 = vpop.f32.mrb[5].mxu0  ;;  %v277_v63 = vpop.f32.mrb[5].mxu1 }
 0x121   :  { %v238_v0 = vadd.f32 %v328_v41, %v237_v62  ;;  %v278_v1 = vadd.f32 %v328_v41, %v277_v63 }
 0x122   :  { %301 = vst [vmem:[#allocation2 + $0x28] sm:$0xff] %v243_v60  ;;  %309 = vst [vmem:[#allocation2 + $0x68] sm:$0xff] %v283_v61 }
 0x123   :  { %300 = vst [vmem:[#allocation2 + $0x20] sm:$0xff] %v238_v0  ;;  %308 = vst [vmem:[#allocation2 + $0x60] sm:$0xff] %v278_v1  ;;  %v436_v2 = vpop.f32.mrb[6].mxu0  ;;  %v448_v3 = vpop.f32.mrb[6].mxu1 }
 0x124   :  { %v253_v4 = vadd.f32 %v436_v2, %v328_v41  ;;  %v293_v5 = vadd.f32 %v448_v3, %v328_v41  ;;  %v247_v6 = vpop.f32.mrb[7].mxu0  ;;  %v287_v7 = vpop.f32.mrb[7].mxu1 }
 0x125   :  { %v248_v8 = vadd.f32 %v328_v41, %v247_v6  ;;  %v288_v9 = vadd.f32 %v328_v41, %v287_v7 }
 0x126   :  { %303 = vst [vmem:[#allocation2 + $0x38] sm:$0xff] %v253_v4  ;;  %311 = vst [vmem:[#allocation2 + $0x78] sm:$0xff] %v293_v5 }
 0x127   :  { %302 = vst [vmem:[#allocation2 + $0x30] sm:$0xff] %v248_v8  ;;  %310 = vst [vmem:[#allocation2 + $0x70] sm:$0xff] %v288_v9 }
 0x128   :  { %316 = vsyncadd [#allocation3], 1792  ;;  %s540_s0 = smov [#allocation2]  }
 0x129   :  { %s317_s2 = sshll.u32 %s540_s0, 4  ;;  %s318_s2 = int_to_ptr.vmem [resolvable:$true] %s317_s2 }
 0x12a   :  { %s516_s22 = scalar_lea.vmem %s318_s2, 256  ;;  %s520_s23 = scalar_lea.vmem %s318_s2, 2048 }
 0x12b   :  { %p517_p0 = scmp.ne.s32.totalorder %s318_s2, %s516_s22  ;;  %p521_p1 = scmp.lt.s32.totalorder %s318_s2, %s318_s2 }
 0x12c   :  { %p522_p2 = scmp.lt.s32.totalorder %s520_s23, %s516_s22 }
 0x12e   :  { %p523_p3 = por %p522_p2, %p521_p1 }
 0x130   :  { %p524_p4 = pnand %p523_p3, %p517_p0 }
 0x132   :  { %527 = shalt.err (!%p524_p4)
}
 0x133   :  { %s528_s26 = scalar_lea.hbm %s763_s3, 256 }
 0x134   :  { %p529_p5 = scmp.ne.s32.totalorder %s763_s3, %s528_s26  ;;  %p532_p6 = scmp.lt.u32.totalorder %s528_s26, %s763_s3 }
 0x136   :  { %p534_p7 = pnand %p532_p6, %p529_p5 }
 0x138   :  { %537 = shalt.err (!%p534_p7)
}
 0x139   :  { %s541_s4 = smov 128   ;;  %s542_s5 = smov 8  }
 0x13a   :  { %323 = dma.vmem_to_hbm [thread:$0]  %s318_s2, 256, %s763_s3, [#allocation3], %s541_s4, %s541_s4, %s542_s5  }
 0x13b   :  { %538 = dma.done.wait [#allocation3], 2048  }
 0x13c   :  { %539 = vsyncadd [#allocation3], 4294965248 }
 0x13d   :  { %327 = vsyncpa [#allocation3], 1 }

</bundles_post_ra>
